<compile_context>
chip_gen: v7x
topology: tpu7x:2x2x1
jax: 0.10.0
libtpu: 0.0.40
codegen_flags: <defaults>
</compile_context>

<pallas_src>
import functools

import jax
import jax.numpy as jnp
from jax.experimental import pallas as pl
from jax.experimental.pallas import tpu as pltpu


def _round_up(v, m):
    return (v + m - 1) // m * m


# ---------------------------------------------------------------------------
# Fused Pallas kernel: full cascade (recurrence once + fused projections).
# ---------------------------------------------------------------------------
def _cascade_kernel(s_ref, x_ref, w_ref, b_ref, o_ref, *, k_max, alpha,
                    use_bf16):
    # s_ref : (Np, Np)               scaled Laplacian (f32)
    # x_ref : (Np, Fp)               zero-padded node features (f32)
    # w_ref : ((Kmax+1)*Fp, FO*Fop)  block-structured stacked weights
    # b_ref : (1, FO*Fop)            stacked biases
    # o_ref : (Np, FO*Fop)           lane-dense output slab
    fp = x_ref.shape[1]
    x = x_ref[...]

    if use_bf16:
        S = s_ref[...].astype(jnp.bfloat16)

        def dot_s(t):
            return jnp.dot(S, t.astype(jnp.bfloat16),
                           preferred_element_type=jnp.float32)
    else:
        S = s_ref[...]

        def dot_s(t):
            return jnp.dot(S, t, preferred_element_type=jnp.float32)

    def proj(k, t):
        # Static slice of the stacked weight -> zero-cost ref view.
        return jnp.dot(t, w_ref[k * fp:(k + 1) * fp, :],
                       preferred_element_type=jnp.float32)

    # k = 0 : C_0(S) x = x
    tx_pp = x
    acc = proj(0, tx_pp)

    # k = 1 : C_1(S) x = 2*alpha * S x   (K >= 1 always in CascadeLayer)
    tx_p = (2.0 * alpha) * dot_s(x)
    acc = acc + proj(1, tx_p)

    # k >= 2 : three-term Gegenbauer recurrence (k_max is static -> unrolled)
    for k in range(2, k_max + 1):
        c1 = 2.0 * (k + alpha - 1.0) / k
        c2 = (k + 2.0 * alpha - 2.0) / k
        tx = c1 * dot_s(tx_p) - c2 * tx_pp
        acc = acc + proj(k, tx)
        tx_pp, tx_p = tx_p, tx

    out = acc + b_ref[...]
    o_ref[...] = jnp.maximum(out, 0.0).astype(o_ref.dtype)   # ReLU fused


# ---------------------------------------------------------------------------
# Dense scaled Laplacian from (edge_index, edge_weight).
# ---------------------------------------------------------------------------
def scaled_laplacian_dense(edge_index, edge_weight, num_nodes):
    A = jnp.zeros((num_nodes, num_nodes), jnp.float32)
    A = A.at[edge_index[0], edge_index[1]].add(edge_weight.astype(jnp.float32))
    deg = A.sum(axis=1)
    dinv = jnp.where(deg > 0, jax.lax.rsqrt(deg), 0.0)
    A_norm = dinv[:, None] * A * dinv[None, :]
    # \hat{L} = (2/lambda_max)(I - A_norm) - I  with lambda_max = 2  ->  -A_norm
    return -A_norm


# ---------------------------------------------------------------------------
# CascadeLayer forward: list of [GegConv(K=i+1) -> ReLU -> dropout] outputs.
# ---------------------------------------------------------------------------
def cascade_layer_forward(x, edge_index, edge_weight, params, *, alpha, dropout,
                          training=False, use_bf16=True):
    # F.dropout(..., training=False) is the identity (eval mode).
    # TODO(synk): training-mode dropout (stateful PRNG mask) not implemented.
    del dropout, training

    N, f_in = x.shape
    fo = len(params)                     # filter_order
    k_max = fo                           # conv i uses K = i + 1; largest = fo
    f_out = params[0][0].shape[-1]

    n_pad = _round_up(N, 8)
    f_in_pad = _round_up(f_in, 128)
    f_out_pad = _round_up(f_out, 128)

    S = scaled_laplacian_dense(edge_index, edge_weight, N)
    s_pad = jnp.zeros((n_pad, n_pad), jnp.float32).at[:N, :N].set(S)
    x_pad = jnp.zeros((n_pad, f_in_pad), jnp.float32).at[:N, :f_in].set(
        x.astype(jnp.float32))

    # Block-structured weights: row block k = Gegenbauer order, col block i = conv.
    w_big = jnp.zeros(((k_max + 1) * f_in_pad, fo * f_out_pad), jnp.float32)
    b_big = jnp.zeros((1, fo * f_out_pad), jnp.float32)
    for i, (W, b) in enumerate(params):
        for k in range(W.shape[0]):      # orders 0..K_i ; higher orders stay zero
            w_big = w_big.at[k * f_in_pad:k * f_in_pad + f_in,
                             i * f_out_pad:i * f_out_pad + f_out].set(W[k])
        b_big = b_big.at[0, i * f_out_pad:i * f_out_pad + f_out].set(b)

    kernel = functools.partial(_cascade_kernel, k_max=k_max, alpha=float(alpha),
                               use_bf16=use_bf16)

    # VMEM footprint (bytes): S (f32 + possible bf16 copy), x, stacked W, bias,
    # output slab, ~3 live Tx working sets, the f32 accumulator; then headroom.
    footprint = 4 * (n_pad * n_pad            # S f32
                     + n_pad * n_pad // 2     # bf16 copy of S
                     + 4 * n_pad * f_in_pad   # x + 3 Tx working sets
                     + (k_max + 1) * f_in_pad * fo * f_out_pad
                     + fo * f_out_pad         # bias
                     + 2 * n_pad * fo * f_out_pad)  # acc + out
    vmem_limit = int(min(max(2 * footprint, 32 << 20), 60 << 20))

    out = pl.pallas_call(
        kernel,
        out_shape=jax.ShapeDtypeStruct((n_pad, fo * f_out_pad), jnp.float32),
        in_specs=[pl.BlockSpec(memory_space=pltpu.MemorySpace.VMEM)] * 4,
        out_specs=pl.BlockSpec(memory_space=pltpu.MemorySpace.VMEM),
        compiler_params=pltpu.CompilerParams(vmem_limit_bytes=vmem_limit),
    )(s_pad, x_pad, w_big, b_big)

    # Slice each conv's lane-dense segment and strip the padding.
    return [out[:N, i * f_out_pad:i * f_out_pad + f_out] for i in range(fo)]


# ---------------------------------------------------------------------------
# Pure-JAX reference (exact f32 math) for validation.
# ---------------------------------------------------------------------------
def _gegconv_relu_ref(S, x, W, b, *, K, alpha):
    tx_pp = x
    acc = tx_pp @ W[0]
    tx_p = 2.0 * alpha * (S @ x)
    acc = acc + tx_p @ W[1]
    for k in range(2, K + 1):
        c1 = 2.0 * (k + alpha - 1.0) / k
        c2 = (k + 2.0 * alpha - 2.0) / k
        tx = c1 * (S @ tx_p) - c2 * tx_pp
        acc = acc + tx @ W[k]
        tx_pp, tx_p = tx_p, tx
    return jnp.maximum(acc + b[None, :], 0.0)


def init_params(key, in_channels, out_channels, filter_order):
    """Deterministic glorot-uniform weights, zero bias, one set per GegConv."""
    params = []
    for i in range(filter_order):
        K = i + 1
        key, wk = jax.random.split(key)
        limit = (6.0 / (in_channels + out_channels)) ** 0.5
        W = jax.random.uniform(wk, (K + 1, in_channels, out_channels),
                               jnp.float32, -limit, limit)
        b = jnp.zeros((out_channels,), jnp.float32)
        params.append((W, b))
    return params


if __name__ == "__main__":
    # Small synthetic graph.
    N, F_IN, F_OUT = 16, 8, 16
    FILTER_ORDER, ALPHA, DROPOUT = 3, 0.5, 0.5

    key = jax.random.PRNGKey(0)
    key, kx, kw, kp = jax.random.split(key, 4)

    x = jax.random.normal(kx, (N, F_IN), jnp.float32)

    # Bidirectional ring graph (deterministic), random positive edge weights.
    src = jnp.arange(N, dtype=jnp.int32)
    dst = (src + 1) % N
    edge_index = jnp.stack(
        [jnp.concatenate([src, dst]), jnp.concatenate([dst, src])], axis=0)
    edge_weight = jax.random.uniform(kw, (2 * N,), jnp.float32, 0.5, 1.5)

    params = init_params(kp, F_IN, F_OUT, FILTER_ORDER)

    # Fast path: bf16 MXU operands for the S@Tx dots (f32 state / accumulation).
    hs = cascade_layer_forward(x, edge_index, edge_weight, params,
                               alpha=ALPHA, dropout=DROPOUT, training=False,
                               use_bf16=True)
    hs = [jax.block_until_ready(h) for h in hs]

    # Exact path: same fused kernel with f32 matmul operands.
    hs_f32 = cascade_layer_forward(x, edge_index, edge_weight, params,
                                   alpha=ALPHA, dropout=DROPOUT, training=False,
                                   use_bf16=False)
    hs_f32 = [jax.block_until_ready(h) for h in hs_f32]

    # Validate against pure-JAX reference.
    S = scaled_laplacian_dense(edge_index, edge_weight, N)
    for i, (W, b) in enumerate(params):
        ref = _gegconv_relu_ref(S, x, W, b, K=i + 1, alpha=ALPHA)
        assert hs[i].shape == (N, F_OUT)
        assert jnp.allclose(hs_f32[i], ref, atol=1e-5, rtol=1e-5), \
            f"f32-path mismatch at conv {i}"
        assert jnp.allclose(hs[i], ref, atol=5e-2, rtol=5e-2), \
            f"bf16-path mismatch at conv {i}"

    print("KERNEL_OK")
</pallas_src>

<mosaic_0001>
module attributes {stable_mosaic.version = 11 : i64} {
  func.func @_cascade_kernel(%arg0: memref<16x16xf32, #tpu.memory_space<vmem>>, %arg1: memref<16x128xf32, #tpu.memory_space<vmem>>, %arg2: memref<512x384xf32, #tpu.memory_space<vmem>>, %arg3: memref<1x384xf32, #tpu.memory_space<vmem>>, %arg4: memref<16x384xf32, #tpu.memory_space<vmem>>) attributes {dimension_semantics = [], scalar_prefetch = 0 : i64, scratch_operands = 0 : i64, tpu.core_type = #tpu.core_type<tc>} {
    %c0 = arith.constant 0 : index
    %c0_0 = arith.constant 0 : index
    %0 = vector.load %arg1[%c0, %c0_0] : memref<16x128xf32, #tpu.memory_space<vmem>>, vector<16x128xf32>
    %c0_1 = arith.constant 0 : index
    %c0_2 = arith.constant 0 : index
    %1 = vector.load %arg0[%c0_1, %c0_2] : memref<16x16xf32, #tpu.memory_space<vmem>>, vector<16x16xf32>
    %2 = arith.truncf %1 : vector<16x16xf32> to vector<16x16xbf16>
    %c0_3 = arith.constant 0 : index
    %c0_4 = arith.constant 0 : index
    %3 = vector.load %arg2[%c0_3, %c0_4] : memref<512x384xf32, #tpu.memory_space<vmem>>, vector<128x384xf32>
    %cst = arith.constant dense<0.000000e+00> : vector<16x384xf32>
    %4 = tpu.matmul %0, %3, %cst {dimension_numbers = #tpu.dot_dimension_numbers<[1], [0], [0], [1], [0, 0, 1, 1], [], []>} : vector<16x128xf32>, vector<128x384xf32>, vector<16x384xf32> -> vector<16x384xf32>
    %5 = arith.truncf %0 : vector<16x128xf32> to vector<16x128xbf16>
    %cst_5 = arith.constant dense<0.000000e+00> : vector<16x128xf32>
    %6 = tpu.matmul %2, %5, %cst_5 {dimension_numbers = #tpu.dot_dimension_numbers<[1], [0], [0], [1], [0, 0, 1, 1], [], []>} : vector<16x16xbf16>, vector<16x128xbf16>, vector<16x128xf32> -> vector<16x128xf32>
    %cst_6 = arith.constant 1.000000e+00 : f32
    %7 = vector.broadcast %cst_6 : f32 to vector<16x128xf32>
    %8 = arith.mulf %7, %6 : vector<16x128xf32>
    %c128 = arith.constant 128 : index
    %c0_7 = arith.constant 0 : index
    %9 = vector.load %arg2[%c128, %c0_7] : memref<512x384xf32, #tpu.memory_space<vmem>>, vector<128x384xf32>
    %cst_8 = arith.constant dense<0.000000e+00> : vector<16x384xf32>
    %10 = tpu.matmul %8, %9, %cst_8 {dimension_numbers = #tpu.dot_dimension_numbers<[1], [0], [0], [1], [0, 0, 1, 1], [], []>} : vector<16x128xf32>, vector<128x384xf32>, vector<16x384xf32> -> vector<16x384xf32>
    %11 = arith.addf %4, %10 : vector<16x384xf32>
    %12 = arith.truncf %8 : vector<16x128xf32> to vector<16x128xbf16>
    %cst_9 = arith.constant dense<0.000000e+00> : vector<16x128xf32>
    %13 = tpu.matmul %2, %12, %cst_9 {dimension_numbers = #tpu.dot_dimension_numbers<[1], [0], [0], [1], [0, 0, 1, 1], [], []>} : vector<16x16xbf16>, vector<16x128xbf16>, vector<16x128xf32> -> vector<16x128xf32>
    %cst_10 = arith.constant 1.500000e+00 : f32
    %14 = vector.broadcast %cst_10 : f32 to vector<16x128xf32>
    %15 = arith.mulf %14, %13 : vector<16x128xf32>
    %cst_11 = arith.constant 5.000000e-01 : f32
    %16 = vector.broadcast %cst_11 : f32 to vector<16x128xf32>
    %17 = arith.mulf %16, %0 : vector<16x128xf32>
    %18 = arith.subf %15, %17 : vector<16x128xf32>
    %c256 = arith.constant 256 : index
    %c0_12 = arith.constant 0 : index
    %19 = vector.load %arg2[%c256, %c0_12] : memref<512x384xf32, #tpu.memory_space<vmem>>, vector<128x384xf32>
    %cst_13 = arith.constant dense<0.000000e+00> : vector<16x384xf32>
    %20 = tpu.matmul %18, %19, %cst_13 {dimension_numbers = #tpu.dot_dimension_numbers<[1], [0], [0], [1], [0, 0, 1, 1], [], []>} : vector<16x128xf32>, vector<128x384xf32>, vector<16x384xf32> -> vector<16x384xf32>
    %21 = arith.addf %11, %20 : vector<16x384xf32>
    %22 = arith.truncf %18 : vector<16x128xf32> to vector<16x128xbf16>
    %cst_14 = arith.constant dense<0.000000e+00> : vector<16x128xf32>
    %23 = tpu.matmul %2, %22, %cst_14 {dimension_numbers = #tpu.dot_dimension_numbers<[1], [0], [0], [1], [0, 0, 1, 1], [], []>} : vector<16x16xbf16>, vector<16x128xbf16>, vector<16x128xf32> -> vector<16x128xf32>
    %cst_15 = arith.constant 1.66666663 : f32
    %24 = vector.broadcast %cst_15 : f32 to vector<16x128xf32>
    %25 = arith.mulf %24, %23 : vector<16x128xf32>
    %cst_16 = arith.constant 0.666666686 : f32
    %26 = vector.broadcast %cst_16 : f32 to vector<16x128xf32>
    %27 = arith.mulf %26, %8 : vector<16x128xf32>
    %28 = arith.subf %25, %27 : vector<16x128xf32>
    %c384 = arith.constant 384 : index
    %c0_17 = arith.constant 0 : index
    %29 = vector.load %arg2[%c384, %c0_17] : memref<512x384xf32, #tpu.memory_space<vmem>>, vector<128x384xf32>
    %cst_18 = arith.constant dense<0.000000e+00> : vector<16x384xf32>
    %30 = tpu.matmul %28, %29, %cst_18 {dimension_numbers = #tpu.dot_dimension_numbers<[1], [0], [0], [1], [0, 0, 1, 1], [], []>} : vector<16x128xf32>, vector<128x384xf32>, vector<16x384xf32> -> vector<16x384xf32>
    %31 = arith.addf %21, %30 : vector<16x384xf32>
    %c0_19 = arith.constant 0 : index
    %c0_20 = arith.constant 0 : index
    %32 = vector.load %arg3[%c0_19, %c0_20] : memref<1x384xf32, #tpu.memory_space<vmem>>, vector<1x384xf32>
    %33 = vector.broadcast %32 : vector<1x384xf32> to vector<16x384xf32>
    %34 = arith.addf %31, %33 : vector<16x384xf32>
    %cst_21 = arith.constant 0.000000e+00 : f32
    %35 = vector.broadcast %cst_21 : f32 to vector<16x384xf32>
    %36 = arith.maximumf %34, %35 : vector<16x384xf32>
    %c0_22 = arith.constant 0 : index
    %c0_23 = arith.constant 0 : index
    %37 = vector.load %arg4[%c0_22, %c0_23] : memref<16x384xf32, #tpu.memory_space<vmem>>, vector<16x384xf32>
    tpu.vector_store %arg4[%c0_22, %c0_23], %36 {strides = array<i32>} : memref<16x384xf32, #tpu.memory_space<vmem>>, vector<16x384xf32>,
    return
  }
}

</mosaic_0001>

<bundles_post_ra>
// kernel: tpu_custom_call.1
= control target key start
LH: loop header
LB: loop body
LE: loop exit
PB: predicated region body
PF: predicated region fallthrough
CT: control target
= control target key end

     0   :  { %9 = vsyncpa [#allocation3], 0  ;;  %s1840_s0 = inlined_call_operand.hbm [shape: f32[16,16], index: 0, kind: input, shape index: {}]   ;;  %s1841_s1 = inlined_call_operand.hbm [shape: f32[16,128], index: 1, kind: input, shape index: {}]   ;;  %s1842_s2 = inlined_call_operand.hbm [shape: f32[512,384], index: 2, kind: input, shape index: {}]   ;;  %s1843_s3 = inlined_call_operand.vmem [shape: f32[1,384], index: 3, kind: input, shape index: {}]   ;;  %s1844_s4 = inlined_call_operand.hbm [shape: f32[16,384], index: 4, kind: output, shape index: {}]  }
   0x1   :  { %10 = vsyncpa [#allocation6], 0 }
   0x2   :  { %11 = vsyncpa [#allocation4], 0  ;;  %s1689_s15 = smov [#allocation5]   ;;  %s1690_s17 = smov [#allocation2]  }
   0x3   :  { %s29_s16 = sshll.u32 %s1689_s15, 4  ;;  %s17_s18 = sshll.u32 %s1690_s17, 4  ;;  %s30_s16 = int_to_ptr.vmem [resolvable:$true] %s29_s16  ;;  %s1724_s18 = int_to_ptr.vmem [resolvable:$true] %s17_s18 }
   0x4   :  { %s1595_s21 = scalar_lea.hbm %s1841_s1, 256 }
   0x5   :  { %p1596_p0 = scmp.ne.s32.totalorder %s1841_s1, %s1595_s21  ;;  %p1599_p1 = scmp.lt.u32.totalorder %s1595_s21, %s1841_s1 }
   0x7   :  { %p1601_p2 = pnand %p1599_p1, %p1596_p0 }
   0x9   :  { %1604 = shalt.err (!%p1601_p2)
}
   0xa   :  { %s1605_s26 = scalar_lea.vmem %s30_s16, 256  ;;  %p1610_p4 = scmp.lt.s32.totalorder %s30_s16, %s30_s16 }
   0xb   :  { %p1606_p3 = scmp.ne.s32.totalorder %s30_s16, %s1605_s26  ;;  %p1611_p5 = scmp.lt.s32.totalorder %s1605_s26, %s1605_s26 }
   0xd   :  { %p1612_p6 = por %p1611_p5, %p1610_p4 }
   0xf   :  { %p1613_p7 = pnand %p1612_p6, %p1606_p3 }
  0x11   :  { %1616 = shalt.err (!%p1613_p7)
}
  0x12   :  { %s1691_s27 = smov 128   ;;  %s1692_s28 = smov 8  }
  0x13   :  { %35 = dma.hbm_to_vmem [thread:$0]  %s1841_s1, 256, %s30_s16, [#allocation6], %s1691_s27, %s1691_s27, %s1692_s28  }
  0x14   :  { %s1617_s7 = scalar_lea.hbm %s1840_s0, 256 }
  0x15   :  { %p1618_p8 = scmp.ne.s32.totalorder %s1840_s0, %s1617_s7  ;;  %p1621_p9 = scmp.lt.u32.totalorder %s1617_s7, %s1840_s0 }
  0x17   :  { %p1623_p10 = pnand %p1621_p9, %p1618_p8 }
  0x19   :  { %1626 = shalt.err (!%p1623_p10)
}
  0x1a   :  { %s1627_s12 = scalar_lea.vmem %s1724_s18, 256  ;;  %p1632_p12 = scmp.lt.s32.totalorder %s1724_s18, %s1724_s18 }
  0x1b   :  { %p1628_p11 = scmp.ne.s32.totalorder %s1724_s18, %s1627_s12  ;;  %p1633_p13 = scmp.lt.s32.totalorder %s1627_s12, %s1627_s12 }
  0x1d   :  { %p1634_p0 = por %p1633_p13, %p1632_p12 }
  0x1f   :  { %p1635_p1 = pnand %p1634_p0, %p1628_p11 }
  0x21   :  { %1638 = shalt.err (!%p1635_p1)
}
  0x22   :  { %23 = dma.hbm_to_vmem [thread:$0]  %s1840_s0, 256, %s1724_s18, [#allocation3], %s1691_s27, %s1691_s27, %s1692_s28  }
  0x23   :  { %s1693_s14 = smov [#allocation7]   ;;  %s1639_s19 = scalar_lea.hbm %s1842_s2, 24576 }
  0x24   :  { %s41_s15 = sshll.u32 %s1693_s14, 4  ;;  %p1640_p2 = scmp.ne.s32.totalorder %s1842_s2, %s1639_s19  ;;  %s42_s15 = int_to_ptr.vmem [resolvable:$true] %s41_s15 }
  0x25   :  { %p1643_p3 = scmp.lt.u32.totalorder %s1639_s19, %s1842_s2 }
  0x27   :  { %p1645_p4 = pnand %p1643_p3, %p1640_p2 }
  0x29   :  { %1648 = shalt.err (!%p1645_p4)
}
  0x2a   :  { %s1649_s24 = scalar_lea.vmem %s42_s15, 24576  ;;  %p1654_p6 = scmp.lt.s32.totalorder %s42_s15, %s42_s15 }
  0x2b   :  { %p1650_p5 = scmp.ne.s32.totalorder %s42_s15, %s1649_s24  ;;  %p1655_p7 = scmp.lt.s32.totalorder %s1649_s24, %s1649_s24 }
  0x2d   :  { %p1656_p8 = por %p1655_p7, %p1654_p6 }
  0x2f   :  { %p1657_p9 = pnand %p1656_p8, %p1650_p5 }
  0x31   :  { %1660 = shalt.err (!%p1657_p9)
}
  0x32   :  { %s1694_s0 = smov 384   ;;  %s1695_s18 = smov 24  }
  0x33   :  { %47 = dma.hbm_to_vmem [thread:$0]  %s1842_s2, 24576, %s42_s15, [#allocation6], %s1694_s0, %s1694_s0, %s1695_s18  }
  0x34   :  { %1683 = dma.done.wait [#allocation3], 256  }
  0x35   :  { %1684 = vsyncadd [#allocation3], 4294967040 }
  0x36   :  { %1685 = dma.done.wait [#allocation6], 24832  }
  0x37   :  { %1686 = vsyncadd [#allocation6], 4294942464  ;;  %v1696_v0 = vmov 0.0   ;;  %vm1697_vm0 = vmmov 0   ;;  %v1774_v1 = vld [vmem:[#allocation5] sm:$0xff]  ;;  %v1776_v2 = vld [vmem:[#allocation5 + $0x8] sm:$0xff] }
  0x38   :  { %1153 = vmatprep.subr.bf16.mxu0 %v1696_v0  ;;  %1155 = vmatprep.mubr.msk.bf16.mxu0 %vm1697_vm0, %v1696_v0  ;;  %v62_v3 = vld [vmem:[#allocation2] sm:$0xff]  ;;  %v113_v4 = vpack.c.bf16 %v1776_v2, %v1774_v1  ;;  %v63_v5 = vld [vmem:[#allocation2 + $0x8] sm:$0xff]  ;;  %v162_v11 = vld [vmem:[#allocation7 + $0x198] sm:$0xff]  ;;  %vm114_vm1 = vcmask 130048  }
  0x39   :  { %271 = vmatprep.mubr.f32.mxu1 %v1696_v0  ;;  %v160_v6 = vld [vmem:[#allocation7 + $0x188] sm:$0xff]  ;;  %v163_v7 = vld [vmem:[#allocation7 + $0x1a0] sm:$0xff]  ;;  %v1780_v8 = vpack.c.bf16 %v63_v5, %v62_v3  ;;  %v161_v12 = vld [vmem:[#allocation7 + $0x190] sm:$0xff] }
  0x3a   :  { %v1311_v9 = vpack.c.bf16 %v163_v7, %v160_v6  ;;  %v159_v10 = vld [vmem:[#allocation7 + $0x180] sm:$0xff]  ;;  %1154 = vmatpush3.bf16.msra.mxu0 %v113_v4  ;;  %v164_v14 = vld [vmem:[#allocation7 + $0x1a8] sm:$0xff]  ;;  %v166_v15 = vld [vmem:[#allocation7 + $0x1b8] sm:$0xff] }
  0x3b   :  { %v1313_v13 = vpack.c.bf16 %v162_v11, %v159_v10  ;;  %v169_v16 = vld [vmem:[#allocation7 + $0x1d0] sm:$0xff]  ;;  %v1343_v17 = vpack.c.bf16 %v164_v14, %v161_v12  ;;  %v168_v20 = vld [vmem:[#allocation7 + $0x1c8] sm:$0xff]  ;;  %v167_v21 = vld [vmem:[#allocation7 + $0x1c0] sm:$0xff] }
  0x3c   :  { %1312 = vmatprep.subr.bf16.mxu1 %v1311_v9  ;;  %v1315_v18 = vpack.c.bf16 %v169_v16, %v166_v15  ;;  %v165_v19 = vld [vmem:[#allocation7 + $0x1b0] sm:$0xff]  ;;  %v170_v23 = vld [vmem:[#allocation7 + $0x1d8] sm:$0xff]  ;;  %v172_v24 = vld [vmem:[#allocation7 + $0x1e8] sm:$0xff] }
  0x3d   :  { %1314 = vmatpush1.bf16.msra.mxu1 %v1313_v13  ;;  %v1317_v22 = vpack.c.bf16 %v168_v20, %v165_v19  ;;  %v175_v25 = vld [vmem:[#allocation7 + $0x200] sm:$0xff]  ;;  %1156 = vmatmul.mubr.msk.bf16.vlgmr.msra.gmra.mrb[0].mxu0 %vm114_vm1, %v1780_v8  ;;  %v1347_v26 = vpack.c.bf16 %v170_v23, %v167_v21  ;;  %v174_v29 = vld [vmem:[#allocation7 + $0x1f8] sm:$0xff]  ;;  %v173_v30 = vld [vmem:[#allocation7 + $0x1f0] sm:$0xff] }
  0x3e   :  { %1344 = vmatprep.subr.bf16.mxu0 %v1343_v17  ;;  %v1319_v27 = vpack.c.bf16 %v175_v25, %v172_v24  ;;  %v171_v28 = vld [vmem:[#allocation7 + $0x1e0] sm:$0xff]  ;;  %1316 = vmatprep.subr.bf16.mxu1 %v1315_v18  ;;  %v176_v31 = vld [vmem:[#allocation7 + $0x208] sm:$0xff]  ;;  %v178_v32 = vld [vmem:[#allocation7 + $0x218] sm:$0xff] }
  0x3f   :  { %1346 = vmatpush3.bf16.msra.mxu0 %v1343_v17  ;;  %v181_v33 = vld [vmem:[#allocation7 + $0x230] sm:$0xff]  ;;  %v1351_v34 = vpack.c.bf16 %v176_v31, %v173_v30  ;;  %v1321_v35 = vpack.c.bf16 %v174_v29, %v171_v28  ;;  %v179_v36 = vld [vmem:[#allocation7 + $0x220] sm:$0xff]  ;;  %v182_v37 = vld [vmem:[#allocation7 + $0x238] sm:$0xff] }
  0x40   :  { %1348 = vmatprep.subr.bf16.mxu0 %v1347_v26  ;;  %v1323_v38 = vpack.c.bf16 %v181_v33, %v178_v32  ;;  %v177_v39 = vld [vmem:[#allocation7 + $0x210] sm:$0xff]  ;;  %v180_v40 = vld [vmem:[#allocation7 + $0x228] sm:$0xff]  ;;  %v187_v42 = vld [vmem:[#allocation7 + $0x260] sm:$0xff]  ;;  %v1355_v43 = vpack.c.bf16 %v182_v37, %v179_v36 }
  0x41   :  { %1318 = vmatpush1.bf16.msra.mxu1 %v1317_v22  ;;  %v184_v41 = vld [vmem:[#allocation7 + $0x248] sm:$0xff]  ;;  %v1325_v44 = vpack.c.bf16 %v180_v40, %v177_v39  ;;  %v185_v45 = vld [vmem:[#allocation7 + $0x250] sm:$0xff]  ;;  %v183_v48 = vld [vmem:[#allocation7 + $0x240] sm:$0xff] }
  0x42   :  { %1320 = vmatprep.subr.bf16.mxu1 %v1319_v27  ;;  %v188_v46 = vld [vmem:[#allocation7 + $0x268] sm:$0xff]  ;;  %v1327_v47 = vpack.c.bf16 %v187_v42, %v184_v41  ;;  %v186_v49 = vld [vmem:[#allocation7 + $0x258] sm:$0xff]  ;;  %v193_v51 = vld [vmem:[#allocation7 + $0x290] sm:$0xff] }
  0x43   :  { %1350 = vmatpush3.bf16.msra.mxu0 %v1347_v26  ;;  %v190_v50 = vld [vmem:[#allocation7 + $0x278] sm:$0xff]  ;;  %v1359_v52 = vpack.c.bf16 %v188_v46, %v185_v45  ;;  %v1329_v53 = vpack.c.bf16 %v186_v49, %v183_v48  ;;  %v191_v54 = vld [vmem:[#allocation7 + $0x280] sm:$0xff]  ;;  %v189_v57 = vld [vmem:[#allocation7 + $0x270] sm:$0xff] }
  0x44   :  { %1352 = vmatprep.subr.bf16.mxu0 %v1351_v34  ;;  %v194_v55 = vld [vmem:[#allocation7 + $0x298] sm:$0xff]  ;;  %v1331_v56 = vpack.c.bf16 %v193_v51, %v190_v50  ;;  %v192_v58 = vld [vmem:[#allocation7 + $0x288] sm:$0xff]  ;;  %v199_v60 = vld [vmem:[#allocation7 + $0x2c0] sm:$0xff] }
  0x45   :  { %1322 = vmatpush1.bf16.msra.mxu1 %v1321_v35  ;;  %v196_v59 = vld [vmem:[#allocation7 + $0x2a8] sm:$0xff]  ;;  %v1363_v61 = vpack.c.bf16 %v194_v55, %v191_v54  ;;  %v1333_v62 = vpack.c.bf16 %v192_v58, %v189_v57  ;;  %v197_v63 = vld [vmem:[#allocation7 + $0x2b0] sm:$0xff]  ;;  %v195_v5 = vld [vmem:[#allocation7 + $0x2a0] sm:$0xff] }
  0x46   :  { %1324 = vmatprep.subr.bf16.mxu1 %v1323_v38  ;;  %v200_v3 = vld [vmem:[#allocation7 + $0x2c8] sm:$0xff]  ;;  %v1335_v4 = vpack.c.bf16 %v199_v60, %v196_v59  ;;  %v198_v6 = vld [vmem:[#allocation7 + $0x2b8] sm:$0xff]  ;;  %v205_v9 = vld [vmem:[#allocation7 + $0x2f0] sm:$0xff] }
  0x47   :  { %1354 = vmatpush3.bf16.msra.mxu0 %v1351_v34  ;;  %v202_v7 = vld [vmem:[#allocation7 + $0x2d8] sm:$0xff]  ;;  %v1367_v10 = vpack.c.bf16 %v200_v3, %v197_v63  ;;  %v1337_v11 = vpack.c.bf16 %v198_v6, %v195_v5  ;;  %v203_v12 = vld [vmem:[#allocation7 + $0x2e0] sm:$0xff]  ;;  %v201_v15 = vld [vmem:[#allocation7 + $0x2d0] sm:$0xff] }
  0x48   :  { %1356 = vmatprep.subr.bf16.mxu0 %v1355_v43  ;;  %v206_v13 = vld [vmem:[#allocation7 + $0x2f8] sm:$0xff]  ;;  %v1339_v14 = vpack.c.bf16 %v205_v9, %v202_v7  ;;  %v204_v16 = vld [vmem:[#allocation7 + $0x2e8] sm:$0xff]  ;;  %v67_v19 = vld [vmem:[#allocation7 + $0x10] sm:$0xff] }
  0x49   :  { %1326 = vmatpush1.bf16.msra.mxu1 %v1325_v44  ;;  %v1371_v17 = vpack.c.bf16 %v206_v13, %v203_v12  ;;  %v1341_v18 = vpack.c.bf16 %v204_v16, %v201_v15  ;;  %v70_v20 = vld [vmem:[#allocation7 + $0x28] sm:$0xff]  ;;  %v69_v23 = vld [vmem:[#allocation7 + $0x20] sm:$0xff]  ;;  %v68_v26 = vld [vmem:[#allocation7 + $0x18] sm:$0xff] }
  0x4a   :  { %1328 = vmatprep.subr.bf16.mxu1 %v1327_v47  ;;  %v1407_v21 = vpack.c.bf16 %v70_v20, %v67_v19  ;;  %v66_v22 = vld [vmem:[#allocation7 + $0x8] sm:$0xff]  ;;  %v65_v25 = vld [vmem:[#allocation7] sm:$0xff]  ;;  %v72_v27 = vld [vmem:[#allocation7 + $0x38] sm:$0xff] }
  0x4b   :  { %1358 = vmatpush3.bf16.msra.mxu0 %v1355_v43  ;;  %v1375_v24 = vpack.c.bf16 %v69_v23, %v66_v22  ;;  %v75_v28 = vld [vmem:[#allocation7 + $0x50] sm:$0xff]  ;;  %v73_v29 = vld [vmem:[#allocation7 + $0x40] sm:$0xff]  ;;  %v76_v30 = vld [vmem:[#allocation7 + $0x58] sm:$0xff]  ;;  %v1377_v31 = vpack.c.bf16 %v68_v26, %v65_v25 }
  0x4c   :  { %1360 = vmatprep.subr.bf16.mxu0 %v1359_v52  ;;  %v1379_v32 = vpack.c.bf16 %v75_v28, %v72_v27  ;;  %v71_v33 = vld [vmem:[#allocation7 + $0x30] sm:$0xff]  ;;  %v74_v34 = vld [vmem:[#allocation7 + $0x48] sm:$0xff]  ;;  %v81_v37 = vld [vmem:[#allocation7 + $0x80] sm:$0xff]  ;;  %v1411_v39 = vpack.c.bf16 %v76_v30, %v73_v29 }
  0x4d   :  { %1330 = vmatpush1.bf16.msra.mxu1 %v1329_v53  ;;  %v78_v36 = vld [vmem:[#allocation7 + $0x68] sm:$0xff]  ;;  %v79_v41 = vld [vmem:[#allocation7 + $0x70] sm:$0xff]  ;;  %v1381_v43 = vpack.c.bf16 %v74_v34, %v71_v33  ;;  %v77_v47 = vld [vmem:[#allocation7 + $0x60] sm:$0xff] }
  0x4e   :  { %1332 = vmatprep.subr.bf16.mxu1 %v1331_v56  ;;  %v82_v42 = vld [vmem:[#allocation7 + $0x88] sm:$0xff]  ;;  %v1383_v46 = vpack.c.bf16 %v81_v37, %v78_v36  ;;  %v80_v48 = vld [vmem:[#allocation7 + $0x78] sm:$0xff]  ;;  %v87_v50 = vld [vmem:[#allocation7 + $0xb0] sm:$0xff] }
  0x4f   :  { %1362 = vmatpush3.bf16.msra.mxu0 %v1359_v52  ;;  %v84_v49 = vld [vmem:[#allocation7 + $0x98] sm:$0xff]  ;;  %v1415_v51 = vpack.c.bf16 %v82_v42, %v79_v41  ;;  %v85_v52 = vld [vmem:[#allocation7 + $0xa0] sm:$0xff]  ;;  %v1385_v54 = vpack.c.bf16 %v80_v48, %v77_v47  ;;  %v83_v56 = vld [vmem:[#allocation7 + $0x90] sm:$0xff] }
  0x50   :  { %1364 = vmatprep.subr.bf16.mxu0 %v1363_v61  ;;  %v88_v53 = vld [vmem:[#allocation7 + $0xb8] sm:$0xff]  ;;  %v1387_v55 = vpack.c.bf16 %v87_v50, %v84_v49  ;;  %v86_v57 = vld [vmem:[#allocation7 + $0xa8] sm:$0xff]  ;;  %v93_v59 = vld [vmem:[#allocation7 + $0xe0] sm:$0xff] }
  0x51   :  { %1334 = vmatpush1.bf16.msra.mxu1 %v1333_v62  ;;  %v90_v58 = vld [vmem:[#allocation7 + $0xc8] sm:$0xff]  ;;  %v1419_v60 = vpack.c.bf16 %v88_v53, %v85_v52  ;;  %v1389_v63 = vpack.c.bf16 %v86_v57, %v83_v56  ;;  %v92_v5 = vld [vmem:[#allocation7 + $0xd8] sm:$0xff]  ;;  %v99_v7 = vld [vmem:[#allocation7 + $0x110] sm:$0xff] }
  0x52   :  { %1336 = vmatprep.subr.bf16.mxu1 %v1335_v4  ;;  %v94_v62 = vld [vmem:[#allocation7 + $0xe8] sm:$0xff]  ;;  %v1391_v3 = vpack.c.bf16 %v93_v59, %v90_v58  ;;  %v89_v4 = vld [vmem:[#allocation7 + $0xc0] sm:$0xff]  ;;  %v96_v6 = vld [vmem:[#allocation7 + $0xf8] sm:$0xff] }
  0x53   :  { %1366 = vmatpush3.bf16.msra.mxu0 %v1363_v61  ;;  %v91_v61 = vld [vmem:[#allocation7 + $0xd0] sm:$0xff]  ;;  %v1393_v12 = vpack.c.bf16 %v92_v5, %v89_v4  ;;  %v1395_v13 = vpack.c.bf16 %v99_v7, %v96_v6  ;;  %v98_v15 = vld [vmem:[#allocation7 + $0x108] sm:$0xff]  ;;  %v101_v23 = vld [vmem:[#allocation7 + $0x120] sm:$0xff] }
  0x54   :  { %1368 = vmatprep.subr.bf16.mxu0 %v1367_v10  ;;  %v1423_v9 = vpack.c.bf16 %v94_v62, %v91_v61  ;;  %v102_v16 = vld [vmem:[#allocation7 + $0x128] sm:$0xff]  ;;  %v103_v19 = vld [vmem:[#allocation7 + $0x130] sm:$0xff]  ;;  %v108_v25 = vld [vmem:[#allocation7 + $0x158] sm:$0xff] }
  0x55   :  { %1338 = vmatpush1.bf16.msra.mxu1 %v1337_v11  ;;  %v100_v11 = vld [vmem:[#allocation7 + $0x118] sm:$0xff]  ;;  %v106_v20 = vld [vmem:[#allocation7 + $0x148] sm:$0xff]  ;;  %v111_v26 = vld [vmem:[#allocation7 + $0x170] sm:$0xff] }
  0x56   :  { %1340 = vmatprep.subr.bf16.mxu1 %v1339_v14  ;;  %v95_v14 = vld [vmem:[#allocation7 + $0xf0] sm:$0xff]  ;;  %v1431_v27 = vpack.c.bf16 %v106_v20, %v103_v19  ;;  %v109_v28 = vld [vmem:[#allocation7 + $0x160] sm:$0xff]  ;;  %v112_v29 = vld [vmem:[#allocation7 + $0x178] sm:$0xff] }
  0x57   :  { %1370 = vmatpush3.bf16.msra.mxu0 %v1367_v10  ;;  %v97_v10 = vld [vmem:[#allocation7 + $0x100] sm:$0xff]  ;;  %v110_v33 = vld [vmem:[#allocation7 + $0x168] sm:$0xff]  ;;  %v1435_v37 = vpack.c.bf16 %v112_v29, %v109_v28  ;;  %v562_v42 = vld [vmem:[#allocation7 + $0x318] sm:$0xff] }
  0x58   :  { %1372 = vmatprep.subr.bf16.mxu0 %v1371_v17  ;;  %v560_v34 = vld [vmem:[#allocation7 + $0x308] sm:$0xff]  ;;  %v563_v36 = vld [vmem:[#allocation7 + $0x320] sm:$0xff]  ;;  %v561_v47 = vld [vmem:[#allocation7 + $0x310] sm:$0xff] }
  0x59   :  { %1342 = vmatpush1.bf16.msra.mxu1 %v1341_v18  ;;  %v1427_v18 = vpack.c.bf16 %v100_v11, %v97_v10  ;;  %v559_v41 = vld [vmem:[#allocation7 + $0x300] sm:$0xff]  ;;  %v564_v48 = vld [vmem:[#allocation7 + $0x328] sm:$0xff]  ;;  %v565_v50 = vld [vmem:[#allocation7 + $0x330] sm:$0xff] }
  0x5a   :  { %1376 = vmatprep.subr.bf16.mxu1 %v1375_v24  ;;  %v104_v24 = vld [vmem:[#allocation7 + $0x138] sm:$0xff]  ;;  %v572_v52 = vld [vmem:[#allocation7 + $0x368] sm:$0xff]  ;;  %v575_v53 = vld [vmem:[#allocation7 + $0x380] sm:$0xff] }
  0x5b   :  { %1374 = vmatpush3.bf16.msra.mxu0 %v1371_v17  ;;  %v105_v17 = vld [vmem:[#allocation7 + $0x140] sm:$0xff]  ;;  %v1401_v30 = vpack.c.bf16 %v104_v24, %v101_v23  ;;  %v570_v57 = vld [vmem:[#allocation7 + $0x358] sm:$0xff]  ;;  %v1447_v58 = vpack.c.bf16 %v575_v53, %v572_v52  ;;  %v581_v62 = vld [vmem:[#allocation7 + $0x3b0] sm:$0xff] }
  0x5c   :  { %1408 = vmatprep.subr.bf16.mxu0 %v1407_v21  ;;  %v1399_v22 = vpack.c.bf16 %v105_v17, %v102_v16  ;;  %v567_v56 = vld [vmem:[#allocation7 + $0x340] sm:$0xff]  ;;  %v578_v61 = vld [vmem:[#allocation7 + $0x398] sm:$0xff]  ;;  %v573_v4 = vld [vmem:[#allocation7 + $0x370] sm:$0xff] }
  0x5d   :  { %v571_v59 = vld [vmem:[#allocation7 + $0x360] sm:$0xff]  ;;  %v576_v5 = vld [vmem:[#allocation7 + $0x388] sm:$0xff]  ;;  %v577_v6 = vld [vmem:[#allocation7 + $0x390] sm:$0xff] }
  0x5e   :  { %v580_v7 = vld [vmem:[#allocation7 + $0x3a8] sm:$0xff]  ;;  %v587_v10 = vld [vmem:[#allocation7 + $0x3e0] sm:$0xff]  ;;  %v1479_v11 = vpack.c.bf16 %v576_v5, %v573_v4  ;;  %v586_v17 = vld [vmem:[#allocation7 + $0x3d8] sm:$0xff] }
  0x5f   :  { %v583_v16 = vld [vmem:[#allocation7 + $0x3c0] sm:$0xff]  ;;  %v593_v19 = vld [vmem:[#allocation7 + $0x410] sm:$0xff]  ;;  %v588_v23 = vld [vmem:[#allocation7 + $0x3e8] sm:$0xff] }
  0x60   :  { %v599_v28 = vld [vmem:[#allocation7 + $0x440] sm:$0xff]  ;;  %v815_v53 = vld [vmem:[#allocation7 + $0x490] sm:$0xff] }
 0x110   :  { %v1784_v35 = vpop.f32.mrb[0].mxu0 }
 0x111   :  { %v1157_v38 = vpop.f32.mrb[1].mxu0  ;;  %272 = vmatmul.mubr.f32.vlgmr.msra.gmra.mrb[0].mxu1 %v1784_v35  ;;  %1191 = vmatprep.mubr.f32.mxu0 %v1784_v35 }
 0x112   :  { %v1788_v40 = vpop.f32.mrb[2].mxu0  ;;  %277 = vmatprep.mubr.f32.mxu1 %v1696_v0  ;;  %1378 = vmatpush1.bf16.msra.mxu1 %v1377_v31  ;;  %v1403_v31 = vpack.c.bf16 %v111_v26, %v108_v25  ;;  %v589_v25 = vld [vmem:[#allocation7 + $0x3f0] sm:$0xff]  ;;  %v592_v26 = vld [vmem:[#allocation7 + $0x408] sm:$0xff] }
 0x113   :  { %v511_v44 = vpack.c.bf16 %v1788_v40, %v1784_v35  ;;  %v1158_v45 = vpop.f32.mrb[3].mxu0  ;;  %1192 = vmatmul.mubr.f32.vlgmr.msra.gmra.mrb[4].mxu0 %v1788_v40  ;;  %1380 = vmatprep.subr.bf16.mxu1 %v1379_v32  ;;  %v107_v32 = vld [vmem:[#allocation7 + $0x150] sm:$0xff] }
 0x114   :  { %1410 = vmatpush3.bf16.msra.mxu0 %v1407_v21  ;;  %1226 = vmatprep.mubr.f32.mxu0 %v1774_v1  ;;  %v1397_v21 = vpack.c.bf16 %v98_v15, %v95_v14  ;;  %v1405_v38 = vpack.c.bf16 %v110_v33, %v107_v32  ;;  %v569_v45 = vld [vmem:[#allocation7 + $0x350] sm:$0xff]  ;;  %v582_v14 = vld [vmem:[#allocation7 + $0x3b8] sm:$0xff] }
 0x115   :  { %278 = vmatmul.mubr.f32.gmra.mrb[2].mxu1 %v1788_v40  ;;  %1412 = vmatprep.subr.bf16.mxu0 %v1411_v39  ;;  %v594_v32 = vld [vmem:[#allocation7 + $0x418] sm:$0xff] }
 0x116   :  { %1382 = vmatpush1.bf16.msra.mxu1 %v1381_v43  ;;  %423 = vmatprep.mubr.f32.mxu1 %v1696_v0  ;;  %v566_v43 = vld [vmem:[#allocation7 + $0x338] sm:$0xff] }
 0x117   :  { %1384 = vmatprep.subr.bf16.mxu1 %v1383_v46  ;;  %v1441_v46 = vpack.c.bf16 %v562_v42, %v559_v41  ;;  %v1443_v49 = vpack.c.bf16 %v569_v45, %v566_v43  ;;  %v600_v41 = vld [vmem:[#allocation7 + $0x448] sm:$0xff]  ;;  %v602_v43 = vld [vmem:[#allocation7 + $0x458] sm:$0xff]  ;;  %v605_v45 = vld [vmem:[#allocation7 + $0x470] sm:$0xff] }
 0x118   :  { %1414 = vmatpush3.bf16.msra.mxu0 %v1411_v39  ;;  %v1439_v39 = vpack.c.bf16 %v563_v36, %v560_v34  ;;  %v595_v34 = vld [vmem:[#allocation7 + $0x420] sm:$0xff]  ;;  %v598_v36 = vld [vmem:[#allocation7 + $0x438] sm:$0xff] }
 0x119   :  { %1416 = vmatprep.subr.bf16.mxu0 %v1415_v51 }
 0x11a   :  { %1386 = vmatpush1.bf16.msra.mxu1 %v1385_v54  ;;  %v1471_v54 = vpack.c.bf16 %v564_v48, %v561_v47  ;;  %v601_v47 = vld [vmem:[#allocation7 + $0x450] sm:$0xff]  ;;  %v604_v48 = vld [vmem:[#allocation7 + $0x468] sm:$0xff] }
 0x11b   :  { %1388 = vmatprep.subr.bf16.mxu1 %v1387_v55 }
 0x11c   :  { %1418 = vmatpush3.bf16.msra.mxu0 %v1415_v51  ;;  %v568_v51 = vld [vmem:[#allocation7 + $0x348] sm:$0xff] }
 0x11d   :  { %1420 = vmatprep.subr.bf16.mxu0 %v1419_v60  ;;  %v1445_v55 = vpack.c.bf16 %v568_v51, %v565_v50  ;;  %v603_v50 = vld [vmem:[#allocation7 + $0x460] sm:$0xff]  ;;  %v606_v51 = vld [vmem:[#allocation7 + $0x478] sm:$0xff] }
 0x11e   :  { %1390 = vmatpush1.bf16.msra.mxu1 %v1389_v63  ;;  %v1475_v63 = vpack.c.bf16 %v570_v57, %v567_v56  ;;  %v1499_v52 = vpack.c.bf16 %v606_v51, %v603_v50  ;;  %v555_v56 = vmul.f32 0.5, %v1774_v1  ;;  %v837_v50 = vld [vmem:[#allocation7 + $0x540] sm:$0xff]  ;;  %v840_v51 = vld [vmem:[#allocation7 + $0x558] sm:$0xff] }
 0x11f   :  { %1392 = vmatprep.subr.bf16.mxu1 %v1391_v3 }
 0x120   :  { %1422 = vmatpush3.bf16.msra.mxu0 %v1419_v60  ;;  %v574_v60 = vld [vmem:[#allocation7 + $0x378] sm:$0xff] }
 0x121   :  { %1424 = vmatprep.subr.bf16.mxu0 %v1423_v9  ;;  %v1449_v3 = vpack.c.bf16 %v574_v60, %v571_v59  ;;  %v556_v60 = vmul.f32 0.5, %v1776_v2 }
 0x122   :  { %1394 = vmatpush1.bf16.msra.mxu1 %v1393_v12  ;;  %v1453_v12 = vpack.c.bf16 %v580_v7, %v577_v6  ;;  %v817_v6 = vld [vmem:[#allocation7 + $0x4a0] sm:$0xff] }
 0x123   :  { %1396 = vmatprep.subr.bf16.mxu1 %v1395_v13  ;;  %v579_v13 = vld [vmem:[#allocation7 + $0x3a0] sm:$0xff] }
 0x124   :  { %1426 = vmatpush3.bf16.msra.mxu0 %v1423_v9  ;;  %v584_v9 = vld [vmem:[#allocation7 + $0x3c8] sm:$0xff]  ;;  %v1483_v20 = vpack.c.bf16 %v582_v14, %v579_v13  ;;  %v816_v13 = vld [vmem:[#allocation7 + $0x498] sm:$0xff] }
 0x125   :  { %1428 = vmatprep.subr.bf16.mxu0 %v1427_v18  ;;  %v1455_v15 = vpack.c.bf16 %v587_v10, %v584_v9  ;;  %v830_v10 = vld [vmem:[#allocation7 + $0x508] sm:$0xff]  ;;  %v820_v14 = vld [vmem:[#allocation7 + $0x4b8] sm:$0xff] }
 0x126   :  { %1398 = vmatpush1.bf16.msra.mxu1 %v1397_v21  ;;  %v1457_v21 = vpack.c.bf16 %v586_v17, %v583_v16 }
 0x127   :  { %1400 = vmatprep.subr.bf16.mxu1 %v1399_v22  ;;  %v585_v22 = vld [vmem:[#allocation7 + $0x3d0] sm:$0xff] }
 0x128   :  { %1430 = vmatpush3.bf16.msra.mxu0 %v1427_v18  ;;  %v590_v18 = vld [vmem:[#allocation7 + $0x3f8] sm:$0xff]  ;;  %v1487_v29 = vpack.c.bf16 %v588_v23, %v585_v22  ;;  %v822_v22 = vld [vmem:[#allocation7 + $0x4c8] sm:$0xff] }
 0x129   :  { %1432 = vmatprep.subr.bf16.mxu0 %v1431_v27  ;;  %v1459_v24 = vpack.c.bf16 %v593_v19, %v590_v18  ;;  %v833_v18 = vld [vmem:[#allocation7 + $0x520] sm:$0xff]  ;;  %v836_v19 = vld [vmem:[#allocation7 + $0x538] sm:$0xff]  ;;  %v826_v23 = vld [vmem:[#allocation7 + $0x4e8] sm:$0xff] }
 0x12a   :  { %1402 = vmatpush1.bf16.msra.mxu1 %v1401_v30  ;;  %v1461_v30 = vpack.c.bf16 %v592_v26, %v589_v25  ;;  %v1547_v25 = vpack.c.bf16 %v836_v19, %v833_v18  ;;  %v810_v19 = vmul.f32 0.6666667, %v1788_v40 }
 0x12b   :  { %1404 = vmatprep.subr.bf16.mxu1 %v1403_v31  ;;  %v591_v31 = vld [vmem:[#allocation7 + $0x400] sm:$0xff] }
 0x12c   :  { %1434 = vmatpush3.bf16.msra.mxu0 %v1431_v27  ;;  %v596_v27 = vld [vmem:[#allocation7 + $0x428] sm:$0xff] }
 0x12d   :  { %1436 = vmatprep.subr.bf16.mxu0 %v1435_v37  ;;  %v1463_v33 = vpack.c.bf16 %v599_v28, %v596_v27  ;;  %v839_v27 = vld [vmem:[#allocation7 + $0x550] sm:$0xff]  ;;  %v842_v28 = vld [vmem:[#allocation7 + $0x568] sm:$0xff] }
 0x12e   :  { %1406 = vmatpush1.bf16.msra.mxu1 %v1405_v38  ;;  %v1465_v38 = vpack.c.bf16 %v598_v36, %v595_v34  ;;  %v1551_v34 = vpack.c.bf16 %v842_v28, %v839_v27 }
 0x12f   :  { %1440 = vmatprep.subr.bf16.mxu1 %v1439_v39  ;;  %v597_v39 = vld [vmem:[#allocation7 + $0x430] sm:$0xff] }
 0x130   :  { %1438 = vmatpush3.bf16.msra.mxu0 %v1435_v37  ;;  %v1491_v37 = vpack.c.bf16 %v594_v32, %v591_v31  ;;  %v1495_v42 = vpack.c.bf16 %v600_v41, %v597_v39  ;;  %v828_v31 = vld [vmem:[#allocation7 + $0x4f8] sm:$0xff]  ;;  %v831_v39 = vld [vmem:[#allocation7 + $0x510] sm:$0xff]  ;;  %v834_v41 = vld [vmem:[#allocation7 + $0x528] sm:$0xff] }
 0x131   :  { %1229 = vmatprep.subr.bf16.mxu0 %v1696_v0  ;;  %424 = vmatmul.mubr.f32.vlgmr.msra.gmra.mrb[0].mxu1 %v1774_v1  ;;  %v827_v1 = vld [vmem:[#allocation7 + $0x4f0] sm:$0xff]  ;;  %v832_v32 = vld [vmem:[#allocation7 + $0x518] sm:$0xff] }
 0x132   :  { %1442 = vmatpush1.bf16.msra.mxu1 %v1441_v46  ;;  %429 = vmatprep.mubr.f32.mxu1 %v1696_v0  ;;  %v1467_v46 = vpack.c.bf16 %v605_v45, %v602_v43  ;;  %v1543_v16 = vpack.c.bf16 %v830_v10, %v827_v1  ;;  %v841_v43 = vld [vmem:[#allocation7 + $0x560] sm:$0xff] }
 0x133   :  { %1227 = vmatmul.mubr.f32.vlgmr.msra.gmra.mrb[4].mxu0 %v1776_v2  ;;  %1444 = vmatprep.subr.bf16.mxu1 %v1443_v49  ;;  %v1469_v49 = vpack.c.bf16 %v604_v48, %v601_v47  ;;  %v851_v47 = vld [vmem:[#allocation7 + $0x5b0] sm:$0xff]  ;;  %v854_v48 = vld [vmem:[#allocation7 + $0x5c8] sm:$0xff]  ;;  %v857_v10 = vld [vmem:[#allocation7 + $0x5e0] sm:$0xff] }
 0x134   :  { %1230 = vmatpush3.bf16.msra.mxu0 %v511_v44  ;;  %1231 = vmatprep.mubr.msk.bf16.mxu0 %vm1697_vm0, %v1696_v0  ;;  %v1451_v44 = vpack.c.bf16 %v581_v62, %v578_v61  ;;  %v821_v62 = vld [vmem:[#allocation7 + $0x4c0] sm:$0xff] }
 0x135   :  { %1472 = vmatprep.subr.bf16.mxu0 %v1471_v54  ;;  %430 = vmatmul.mubr.f32.gmra.mrb[2].mxu1 %v1776_v2  ;;  %v813_v2 = vld [vmem:[#allocation7 + $0x480] sm:$0xff] }
 0x136   :  { %1446 = vmatpush1.bf16.msra.mxu1 %v1445_v55  ;;  %671 = vmatprep.mubr.f32.mxu1 %v1696_v0  ;;  %v1505_v17 = vpack.c.bf16 %v816_v13, %v813_v2 }
 0x137   :  { %1232 = vmatmul.mubr.msk.bf16.vlgmr.msra.gmra.mrb[8].mxu0 %vm114_vm1, %v1780_v8  ;;  %1448 = vmatprep.subr.bf16.mxu1 %v1447_v58 }
 0x138   :  { %1474 = vmatpush3.bf16.msra.mxu0 %v1471_v54  ;;  %v818_v54 = vld [vmem:[#allocation7 + $0x4a8] sm:$0xff] }
 0x139   :  { %1476 = vmatprep.subr.bf16.mxu0 %v1475_v63  ;;  %v1535_v55 = vpack.c.bf16 %v818_v54, %v815_v53  ;;  %v847_v53 = vld [vmem:[#allocation7 + $0x590] sm:$0xff]  ;;  %v1559_v54 = vpack.c.bf16 %v854_v48, %v851_v47 }
 0x13a   :  { %1450 = vmatpush1.bf16.msra.mxu1 %v1449_v3 }
 0x13b   :  { %1452 = vmatprep.subr.bf16.mxu1 %v1451_v44  ;;  %v814_v44 = vld [vmem:[#allocation7 + $0x488] sm:$0xff] }
 0x13c   :  { %1478 = vmatpush3.bf16.msra.mxu0 %v1475_v63  ;;  %v824_v63 = vld [vmem:[#allocation7 + $0x4d8] sm:$0xff] }
 0x13d   :  { %1480 = vmatprep.subr.bf16.mxu0 %v1479_v11  ;;  %v1539_v9 = vpack.c.bf16 %v824_v63, %v821_v62  ;;  %v849_v63 = vld [vmem:[#allocation7 + $0x5a0] sm:$0xff] }
 0x13e   :  { %1454 = vmatpush1.bf16.msra.mxu1 %v1453_v12  ;;  %v1503_v12 = vpack.c.bf16 %v817_v6, %v814_v44  ;;  %v859_v44 = vld [vmem:[#allocation7 + $0x5f0] sm:$0xff] }
 0x13f   :  { %1456 = vmatprep.subr.bf16.mxu1 %v1455_v15  ;;  %v823_v15 = vld [vmem:[#allocation7 + $0x4d0] sm:$0xff] }
 0x140   :  { %1482 = vmatpush3.bf16.msra.mxu0 %v1479_v11 }
 0x141   :  { %1484 = vmatprep.subr.bf16.mxu0 %v1483_v20 }
 0x142   :  { %1458 = vmatpush1.bf16.msra.mxu1 %v1457_v21  ;;  %v819_v21 = vld [vmem:[#allocation7 + $0x4b0] sm:$0xff] }
 0x143   :  { %1460 = vmatprep.subr.bf16.mxu1 %v1459_v24  ;;  %v829_v24 = vld [vmem:[#allocation7 + $0x500] sm:$0xff]  ;;  %v1509_v26 = vpack.c.bf16 %v822_v22, %v819_v21  ;;  %v1021_v22 = vlaneseq }
 0x144   :  { %1486 = vmatpush3.bf16.msra.mxu0 %v1483_v20  ;;  %v1507_v20 = vpack.c.bf16 %v823_v15, %v820_v14  ;;  %v809_v14 = vmul.f32 0.6666667, %v1784_v35  ;;  %v1019_v35 = vld [vmem:[%s1843_s3] sm:$0x7]  ;;  %s1698_s3 = smov [#allocation8]  }
 0x145   :  { %1488 = vmatprep.subr.bf16.mxu0 %v1487_v29  ;;  %s1059_s28 = sshll.u32 %s1698_s3, 4  ;;  %s1060_s28 = int_to_ptr.vmem [resolvable:$true] %s1059_s28 }
 0x146   :  { %1462 = vmatpush1.bf16.msra.mxu1 %v1461_v30  ;;  %v825_v30 = vld [vmem:[#allocation7 + $0x4e0] sm:$0xff]  ;;  %s1661_s29 = scalar_lea.vmem %s1060_s28, 768  ;;  %p1666_p11 = scmp.lt.s32.totalorder %s1060_s28, %s1060_s28 }
 0x147   :  { %1464 = vmatprep.subr.bf16.mxu1 %v1463_v33  ;;  %v835_v33 = vld [vmem:[#allocation7 + $0x530] sm:$0xff]  ;;  %v1513_v36 = vpack.c.bf16 %v828_v31, %v825_v30  ;;  %p1662_p10 = scmp.ne.s32.totalorder %s1060_s28, %s1661_s29  ;;  %p1667_p12 = scmp.lt.s32.totalorder %s1661_s29, %s1661_s29 }
 0x148   :  { %1490 = vmatpush3.bf16.msra.mxu0 %v1487_v29  ;;  %v1511_v29 = vpack.c.bf16 %v829_v24, %v826_v23  ;;  %v1022_v23 = vshrl.u32 %v1021_v22, 7 }
 0x149   :  { %1492 = vmatprep.subr.bf16.mxu0 %v1491_v37  ;;  %p1668_p13 = por %p1667_p12, %p1666_p11 }
 0x14a   :  { %1466 = vmatpush1.bf16.msra.mxu1 %v1465_v38  ;;  %v1515_v38 = vpack.c.bf16 %v835_v33, %v832_v32  ;;  %v1023_v24 = vsub.s32 0, %v1022_v23 }
 0x14b   :  { %1468 = vmatprep.subr.bf16.mxu1 %v1467_v46  ;;  %v1517_v46 = vpack.c.bf16 %v834_v41, %v831_v39  ;;  %p1669_p0 = pnand %p1668_p13, %p1662_p10 }
 0x14c   :  { %1494 = vmatpush3.bf16.msra.mxu0 %v1491_v37  ;;  %v848_v37 = vld [vmem:[#allocation7 + $0x598] sm:$0xff]  ;;  %v1024_v27 = vrot.slane %v1019_v35, %v1023_v24 }
 0x14d   :  { %1496 = vmatprep.subr.bf16.mxu0 %v1495_v42 }
 0x14e   :  { %1470 = vmatpush1.bf16.msra.mxu1 %v1469_v49 }
 0x14f   :  { %1270 = vmatprep.subr.bf16.mxu1 %v1696_v0 }
 0x150   :  { %1498 = vmatpush3.bf16.msra.mxu0 %v1495_v42  ;;  %v838_v42 = vld [vmem:[#allocation7 + $0x548] sm:$0xff] }
 0x151   :  { %1500 = vmatprep.subr.bf16.mxu0 %v1499_v52  ;;  %v1519_v49 = vpack.c.bf16 %v841_v43, %v838_v42 }
 0x154   :  { %1502 = vmatpush3.bf16.msra.mxu0 %v1499_v52  ;;  %v844_v52 = vld [vmem:[#allocation7 + $0x578] sm:$0xff] }
 0x155   :  { %1536 = vmatprep.subr.bf16.mxu0 %v1535_v55 }
 0x20a   :  { %v546_v57 = vpop.f32.mrb[8].mxu0 }
 0x20b   :  { %v553_v58 = vmul.f32 1.5, %v546_v57  ;;  %v1233_v59 = vpop.f32.mrb[9].mxu0  ;;  %v843_v57 = vld [vmem:[#allocation7 + $0x570] sm:$0xff] }
 0x20c   :  { %v549_v61 = vpop.f32.mrb[10].mxu0  ;;  %v850_v59 = vld [vmem:[#allocation7 + $0x5a8] sm:$0xff] }
 0x20d   :  { %v557_v3 = vsub.f32 %v553_v58, %v555_v56  ;;  %v554_v4 = vmul.f32 1.5, %v549_v61  ;;  %v1234_v5 = vpop.f32.mrb[11].mxu0  ;;  %v1523_v56 = vpack.c.bf16 %v847_v53, %v844_v52  ;;  %v846_v58 = vld [vmem:[#allocation7 + $0x588] sm:$0xff] }
 0x20e   :  { %v1525_v61 = vpack.c.bf16 %v846_v58, %v843_v57  ;;  %v856_v5 = vld [vmem:[#allocation7 + $0x5d8] sm:$0xff] }
 0x20f   :  { %v558_v7 = vsub.f32 %v554_v4, %v556_v60  ;;  %672 = vmatmul.mubr.f32.vlgmr.msra.gmra.mrb[0].mxu1 %v557_v3  ;;  %1267 = vmatprep.mubr.f32.mxu0 %v557_v3  ;;  %v853_v60 = vld [vmem:[#allocation7 + $0x5c0] sm:$0xff]  ;;  %v1531_v6 = vpack.c.bf16 %v859_v44, %v856_v5 }
 0x210   :  { %677 = vmatprep.mubr.f32.mxu1 %v1696_v0  ;;  %v1527_v62 = vpack.c.bf16 %v853_v60, %v850_v59 }
 0x211   :  { %v765_v11 = vpack.c.bf16 %v558_v7, %v557_v3  ;;  %1268 = vmatmul.mubr.f32.vlgmr.msra.gmra.mrb[4].mxu0 %v558_v7  ;;  %v852_v3 = vld [vmem:[#allocation7 + $0x5b8] sm:$0xff] }
 0x212   :  { %1538 = vmatpush3.bf16.msra.mxu0 %v1535_v55  ;;  %v1521_v55 = vpack.c.bf16 %v840_v51, %v837_v50  ;;  %v1529_v4 = vpack.c.bf16 %v852_v3, %v849_v63 }
 0x213   :  { %678 = vmatmul.mubr.f32.gmra.mrb[2].mxu1 %v558_v7  ;;  %1540 = vmatprep.subr.bf16.mxu0 %v1539_v9  ;;  %v855_v7 = vld [vmem:[#allocation7 + $0x5d0] sm:$0xff] }
 0x214   :  { %1271 = vmatpush3.bf16.msra.mxu1 %v765_v11  ;;  %1272 = vmatprep.mubr.msk.bf16.mxu1 %vm1697_vm0, %v1696_v0  ;;  %v860_v11 = vld [vmem:[#allocation7 + $0x5f8] sm:$0xff] }
 0x215   :  { %1504 = vmatprep.subr.bf16.mxu1 %v1503_v12  ;;  %v1563_v12 = vpack.c.bf16 %v860_v11, %v857_v10 }
 0x216   :  { %1542 = vmatpush3.bf16.msra.mxu0 %v1539_v9  ;;  %v858_v9 = vld [vmem:[#allocation7 + $0x5e8] sm:$0xff] }
 0x217   :  { %1273 = vmatmul.mubr.msk.bf16.vlgmr.msra.gmra.mrb[4].mxu1 %vm114_vm1, %v1780_v8  ;;  %1544 = vmatprep.subr.bf16.mxu0 %v1543_v16  ;;  %v845_v8 = vld [vmem:[#allocation7 + $0x580] sm:$0xff]  ;;  %v1533_v1 = vpack.c.bf16 %v858_v9, %v855_v7 }
 0x218   :  { %1506 = vmatpush1.bf16.msra.mxu1 %v1505_v17  ;;  %925 = vmatprep.mubr.f32.mxu1 %v1696_v0  ;;  %v1555_v45 = vpack.c.bf16 %v848_v37, %v845_v8 }
 0x219   :  { %1508 = vmatprep.subr.bf16.mxu1 %v1507_v20 }
 0x21a   :  { %1546 = vmatpush3.bf16.msra.mxu0 %v1543_v16 }
 0x21b   :  { %1548 = vmatprep.subr.bf16.mxu0 %v1547_v25 }
 0x21c   :  { %1510 = vmatpush1.bf16.msra.mxu1 %v1509_v26  ;;  %v1031_v26 = vsub.s32 2, %v1022_v23 }
 0x21d   :  { %1512 = vmatprep.subr.bf16.mxu1 %v1511_v29 }
 0x21e   :  { %1550 = vmatpush3.bf16.msra.mxu0 %v1547_v25  ;;  %v1027_v25 = vsub.s32 1, %v1022_v23  ;;  %v1032_v40 = vrot.slane %v1019_v35, %v1031_v26 }
 0x21f   :  { %1552 = vmatprep.subr.bf16.mxu0 %v1551_v34 }
 0x220   :  { %1514 = vmatpush1.bf16.msra.mxu1 %v1513_v36  ;;  %v1028_v28 = vrot.slane %v1019_v35, %v1027_v25 }
 0x221   :  { %1516 = vmatprep.subr.bf16.mxu1 %v1515_v38 }
 0x222   :  { %1554 = vmatpush3.bf16.msra.mxu0 %v1551_v34 }
 0x223   :  { %1556 = vmatprep.subr.bf16.mxu0 %v1555_v45 }
 0x224   :  { %1518 = vmatpush1.bf16.msra.mxu1 %v1517_v46 }
 0x225   :  { %1520 = vmatprep.subr.bf16.mxu1 %v1519_v49 }
 0x226   :  { %1558 = vmatpush3.bf16.msra.mxu0 %v1555_v45 }
 0x227   :  { %1560 = vmatprep.subr.bf16.mxu0 %v1559_v54 }
 0x228   :  { %1522 = vmatpush1.bf16.msra.mxu1 %v1521_v55 }
 0x229   :  { %1524 = vmatprep.subr.bf16.mxu1 %v1523_v56 }
 0x22a   :  { %1562 = vmatpush3.bf16.msra.mxu0 %v1559_v54 }
 0x22b   :  { %1564 = vmatprep.subr.bf16.mxu0 %v1563_v12 }
 0x22c   :  { %1526 = vmatpush1.bf16.msra.mxu1 %v1525_v61 }
 0x22d   :  { %1528 = vmatprep.subr.bf16.mxu1 %v1527_v62 }
 0x22e   :  { %1566 = vmatpush3.bf16.msra.mxu0 %v1563_v12 }
 0x230   :  { %1530 = vmatpush1.bf16.msra.mxu1 %v1529_v4 }
 0x231   :  { %1532 = vmatprep.subr.bf16.mxu1 %v1531_v6 }
 0x234   :  { %1534 = vmatpush1.bf16.msra.mxu1 %v1533_v1 }
 0x2ea   :  { %v800_v2 = vpop.f32.mrb[4].mxu1 }
 0x2eb   :  { %v807_v13 = vmul.f32 1.6666666, %v800_v2  ;;  %v1274_v15 = vpop.f32.mrb[5].mxu1 }
 0x2ec   :  { %v803_v16 = vpop.f32.mrb[6].mxu1 }
 0x2ed   :  { %v811_v17 = vsub.f32 %v807_v13, %v809_v14  ;;  %v808_v18 = vmul.f32 1.6666666, %v803_v16  ;;  %v1275_v20 = vpop.f32.mrb[7].mxu1 }
 0x2ef   :  { %v812_v21 = vsub.f32 %v808_v18, %v810_v19  ;;  %926 = vmatmul.mubr.f32.vlgmr.msra.gmra.mrb[0].mxu1 %v811_v17  ;;  %1308 = vmatprep.mubr.f32.mxu0 %v811_v17 }
 0x2f0   :  { %931 = vmatprep.mubr.f32.mxu1 %v1696_v0 }
 0x2f1   :  { %1309 = vmatmul.mubr.f32.vlgmr.msra.gmra.mrb[4].mxu0 %v812_v21 }
 0x2f3   :  { %932 = vmatmul.mubr.f32.gmra.mrb[2].mxu1 %v812_v21 }
 0x3c2   :  { %v927_v29 = vpop.f32.mrb[0].mxu1 }
 0x3c3   :  { %v1036_v30 = vadd.f32 %v1024_v27, %v927_v29  ;;  %v929_v31 = vpop.f32.mrb[1].mxu1 }
 0x3c4   :  { %v1037_v32 = vadd.f32 %v1028_v28, %v929_v31  ;;  %v1310_v33 = vpop.f32.mrb[4].mxu0 }
 0x3c5   :  { %v1042_v0 = vmax.f32 %v1036_v30, 0.0  ;;  %v1041_v34 = vadd.f32 %v1310_v33, %v1032_v40  ;;  %v1004_v36 = vpop.f32.mrb[5].mxu0 }
 0x3c6   :  { %v1043_v8 = vmax.f32 %v1037_v32, 0.0  ;;  %v1038_v37 = vadd.f32 %v1032_v40, %v1004_v36  ;;  %v933_v38 = vpop.f32.mrb[2].mxu1 }
 0x3c7   :  { %1048 = vst [vmem:[#allocation8] sm:$0xff] %v1042_v0  ;;  %v1047_v39 = vmax.f32 %v1041_v34, 0.0  ;;  %v1039_v41 = vadd.f32 %v1024_v27, %v933_v38  ;;  %v935_v42 = vpop.f32.mrb[3].mxu1 }
 0x3c8   :  { %1049 = vst [vmem:[#allocation8 + $0x8] sm:$0xff] %v1043_v8  ;;  %v1044_v43 = vmax.f32 %v1038_v37, 0.0  ;;  %v1040_v45 = vadd.f32 %v1028_v28, %v935_v42 }
 0x3c9   :  { %1053 = vst [vmem:[#allocation8 + $0x28] sm:$0xff] %v1047_v39  ;;  %v1045_v46 = vmax.f32 %v1039_v41, 0.0 }
 0x3ca   :  { %1050 = vst [vmem:[#allocation8 + $0x10] sm:$0xff] %v1044_v43  ;;  %v1046_v47 = vmax.f32 %v1040_v45, 0.0 }
 0x3cb   :  { %1051 = vst [vmem:[#allocation8 + $0x18] sm:$0xff] %v1045_v46 }
 0x3cc   :  { %1052 = vst [vmem:[#allocation8 + $0x20] sm:$0xff] %v1046_v47 }
 0x3cd   :  { %1672 = shalt.err (!%p1669_p0)
}
 0x3ce   :  { %s1673_s6 = scalar_lea.hbm %s1844_s4, 768 }
 0x3cf   :  { %p1674_p1 = scmp.ne.s32.totalorder %s1844_s4, %s1673_s6  ;;  %p1677_p2 = scmp.lt.u32.totalorder %s1673_s6, %s1844_s4 }
 0x3d1   :  { %p1679_p3 = pnand %p1677_p2, %p1674_p1 }
 0x3d3   :  { %1682 = shalt.err (!%p1679_p3)
}
 0x3d4   :  { %1065 = dma.vmem_to_hbm [thread:$0]  %s1060_s28, 768, %s1844_s4, [#allocation4], %s1694_s0, %s1694_s0, %s1695_s18  }
 0x3d5   :  { %1687 = dma.done.wait [#allocation4], 768  }
 0x3d6   :  { %1688 = vsyncadd [#allocation4], 4294966528 }
 0x3d7   :  { %1069 = vsyncpa [#allocation3], 1 }
 0x3d8   :  { %1070 = vsyncpa [#allocation6], 1 }
 0x3d9   :  { %1071 = vsyncpa [#allocation4], 1 }

</bundles_post_ra>
